<compile_context>
chip_gen: v7x
topology: tpu7x:2x2x1
jax: 0.10.0
libtpu: 0.0.40
codegen_flags: <defaults>
</compile_context>

<pallas_src>
import functools

import jax
import jax.numpy as jnp
from jax import lax
from jax.experimental import pallas as pl
from jax.experimental.pallas import tpu as pltpu

LANE = 128
SUBLANE = 8
MAX_BLOCK_ROWS = 1024  # 1024x128 f32 = 512 KiB per input block


def _focal_partial_kernel(x_ref, t_ref, sum_ref, cnt_ref, *,
                          ignore_index, n_valid, block_rows, need_tail_mask):
    x = x_ref[...]            # (block_rows, LANE) f32
    t = t_ref[...]

    # valid-element mask: targets != ignore_index, AND (optionally) inside the
    # true element range (handles lane padding / partial last block garbage).
    mask = t != jnp.float32(ignore_index)
    if need_tail_mask:
        b = pl.program_id(0)
        row = lax.broadcasted_iota(jnp.int32, x.shape, 0) + b * block_rows
        lane = lax.broadcasted_iota(jnp.int32, x.shape, 1)
        mask = jnp.logical_and(mask, row * LANE + lane < n_valid)

    # Numerically-stable BCEWithLogits per element:
    #   max(x, 0) - x*t + log1p(exp(-|x|))
    bce = jnp.maximum(x, 0.0) - x * t + jnp.log1p(jnp.exp(-jnp.abs(x)))
    bce = jnp.where(mask, bce, 0.0)
    cnt = mask.astype(jnp.float32)

    # Fold the block down to one vreg-shaped (8, 128) partial per output:
    # pure elementwise vreg adds (VPU), no cross-lane movement.
    sum_ref[...] = jnp.sum(bce.reshape(-1, SUBLANE, LANE), axis=0
                           ).reshape(1, SUBLANE, LANE)
    cnt_ref[...] = jnp.sum(cnt.reshape(-1, SUBLANE, LANE), axis=0
                           ).reshape(1, SUBLANE, LANE)


def focal_loss(inputs, targets, *, alpha=0.25, gamma=2, ignore_index=255):
    """Pallas TPU implementation of FocalLoss.forward (scalar f32 loss)."""
    x = jnp.asarray(inputs, jnp.float32).reshape(-1)
    t = jnp.asarray(targets, jnp.float32).reshape(-1)
    n = x.shape[0]

    # Minimal padding only: to one (8,128) tile for tiny inputs, otherwise
    # only to a lane multiple (<=127 elems). Padded targets get ignore_index
    # and are additionally masked in-kernel by the true element count.
    if n < SUBLANE * LANE:
        pad = SUBLANE * LANE - n
    else:
        pad = (-n) % LANE
    if pad:
        x = jnp.pad(x, (0, pad))
        t = jnp.pad(t, (0, pad), constant_values=float(ignore_index))
    rows = (n + pad) // LANE
    x2 = x.reshape(rows, LANE)
    t2 = t.reshape(rows, LANE)

    # Big blocks (up to 1024 rows), multiple of 8 rows; for small inputs use
    # ~half the rows per block so the parallel axis still has >=2 steps
    # (lets v7x shard across its two TensorCores).
    block_rows = min(MAX_BLOCK_ROWS,
                     max(SUBLANE, ((rows // 2) // SUBLANE) * SUBLANE))
    num_blocks = pl.cdiv(rows, block_rows)
    need_tail_mask = (num_blocks * block_rows * LANE) != n

    kernel = functools.partial(
        _focal_partial_kernel,
        ignore_index=float(ignore_index),
        n_valid=int(n),
        block_rows=int(block_rows),
        need_tail_mask=bool(need_tail_mask))

    sums, cnts = pl.pallas_call(
        kernel,
        out_shape=(
            jax.ShapeDtypeStruct((num_blocks, SUBLANE, LANE), jnp.float32),
            jax.ShapeDtypeStruct((num_blocks, SUBLANE, LANE), jnp.float32),
        ),
        grid_spec=pltpu.PrefetchScalarGridSpec(
            num_scalar_prefetch=0,
            grid=(num_blocks,),
            in_specs=[
                pl.BlockSpec((block_rows, LANE), lambda i: (i, 0)),
                pl.BlockSpec((block_rows, LANE), lambda i: (i, 0)),
            ],
            out_specs=(
                pl.BlockSpec((1, SUBLANE, LANE), lambda i: (i, 0, 0)),
                pl.BlockSpec((1, SUBLANE, LANE), lambda i: (i, 0, 0)),
            ),
        ),
        compiler_params=pltpu.CompilerParams(
            dimension_semantics=("parallel",)),
    )(x2, t2)

    # Tiny epilogue in the wrapper: reduce the partials and apply the focal
    # transform on the mean BCE (matches BCEWithLogitsLoss reduction='mean').
    bce_sum = jnp.sum(sums)
    valid_cnt = jnp.sum(cnts)
    mean_bce = bce_sum / valid_cnt
    logpt = -mean_bce
    pt = jnp.exp(logpt)
    return -((1.0 - pt) ** gamma) * alpha * logpt


def focal_loss_ref(inputs, targets, *, alpha=0.25, gamma=2, ignore_index=255):
    """Pure-JAX reference mirroring the PyTorch module."""
    x = jnp.asarray(inputs, jnp.float32).reshape(-1)
    t = jnp.asarray(targets, jnp.float32).reshape(-1)
    mask = t != float(ignore_index)
    bce = jnp.maximum(x, 0.0) - x * t + jnp.log1p(jnp.exp(-jnp.abs(x)))
    mean_bce = (jnp.sum(jnp.where(mask, bce, 0.0))
                / jnp.sum(mask.astype(jnp.float32)))
    logpt = -mean_bce
    pt = jnp.exp(logpt)
    return -((1.0 - pt) ** gamma) * alpha * logpt


if __name__ == "__main__":
    key = jax.random.PRNGKey(0)
    k1, k2, k3 = jax.random.split(key, 3)

    # Small NCHW shape: batch=2, channels=4, spatial=16x16.
    shape = (2, 4, 16, 16)
    logits = jax.random.normal(k1, shape, dtype=jnp.float32)
    # Binary targets (0/1) with some pixels set to ignore_index=255.
    targets = jax.random.bernoulli(k2, 0.5, shape).astype(jnp.float32)
    ignore_mask = jax.random.bernoulli(k3, 0.1, shape)
    targets = jnp.where(ignore_mask, jnp.float32(255.0), targets)

    loss = focal_loss(logits, targets)
    jax.block_until_ready(loss)

    ref = focal_loss_ref(logits, targets)
    assert jnp.allclose(loss, ref, rtol=1e-5, atol=1e-6), (loss, ref)

    print("KERNEL_OK")
</pallas_src>

<mosaic_0001>
module attributes {stable_mosaic.version = 11 : i64} {
  func.func @_focal_partial_kernel(%arg0: i32, %arg1: memref<8x128xf32, #tpu.memory_space<vmem>>, %arg2: memref<8x128xf32, #tpu.memory_space<vmem>>, %arg3: memref<1x8x128xf32, #tpu.memory_space<vmem>>, %arg4: memref<1x8x128xf32, #tpu.memory_space<vmem>>) attributes {dimension_semantics = [#tpu.dimension_semantics<parallel>], iteration_bounds = array<i64: 2>, scalar_prefetch = 0 : i64, scratch_operands = 0 : i64, tpu.core_type = #tpu.core_type<tc>, window_params = [{transform_indices = @transform_0, window_bounds = array<i64: 8, 128>}, {transform_indices = @transform_1, window_bounds = array<i64: 8, 128>}, {transform_indices = @transform_2, window_bounds = array<i64: 1, 8, 128>}, {transform_indices = @transform_3, window_bounds = array<i64: 1, 8, 128>}]} {
    %c0 = arith.constant 0 : index
    %c0_0 = arith.constant 0 : index
    %0 = vector.load %arg1[%c0, %c0_0] : memref<8x128xf32, #tpu.memory_space<vmem>>, vector<8x128xf32>
    %c0_1 = arith.constant 0 : index
    %c0_2 = arith.constant 0 : index
    %1 = vector.load %arg2[%c0_1, %c0_2] : memref<8x128xf32, #tpu.memory_space<vmem>>, vector<8x128xf32>
    %cst = arith.constant 2.550000e+02 : f32
    %2 = vector.broadcast %cst : f32 to vector<8x128xf32>
    %3 = arith.cmpf one, %1, %2 : vector<8x128xf32>
    %cst_3 = arith.constant 0.000000e+00 : f32
    %4 = vector.broadcast %cst_3 : f32 to vector<8x128xf32>
    %5 = arith.maximumf %0, %4 : vector<8x128xf32>
    %6 = arith.mulf %0, %1 : vector<8x128xf32>
    %7 = arith.subf %5, %6 : vector<8x128xf32>
    %8 = math.absf %0 : vector<8x128xf32>
    %cst_4 = arith.constant 0.000000e+00 : f32
    %9 = vector.broadcast %cst_4 : f32 to vector<8x128xf32>
    %10 = arith.subf %9, %8 : vector<8x128xf32>
    %11 = math.exp %10 : vector<8x128xf32>
    %12 = math.log1p %11 : vector<8x128xf32>
    %13 = arith.addf %7, %12 : vector<8x128xf32>
    %cst_5 = arith.constant 0.000000e+00 : f32
    %14 = vector.broadcast %cst_5 : f32 to vector<8x128xf32>
    %15 = arith.select %3, %13, %14 : vector<8x128xi1>, vector<8x128xf32>
    %16 = arith.extui %3 : vector<8x128xi1> to vector<8x128xi32>
    %17 = arith.sitofp %16 : vector<8x128xi32> to vector<8x128xf32>
    %18 = vector.shape_cast %15 : vector<8x128xf32> to vector<1x8x128xf32>
    %cst_6 = arith.constant dense<0.000000e+00> : vector<8x128xf32>
    %19 = vector.multi_reduction <add>, %18, %cst_6 [0] : vector<1x8x128xf32> to vector<8x128xf32>
    %20 = vector.shape_cast %19 : vector<8x128xf32> to vector<1x8x128xf32>
    %c0_7 = arith.constant 0 : index
    %c0_8 = arith.constant 0 : index
    %c0_9 = arith.constant 0 : index
    %21 = vector.load %arg3[%c0_7, %c0_8, %c0_9] : memref<1x8x128xf32, #tpu.memory_space<vmem>>, vector<1x8x128xf32>
    tpu.vector_store %arg3[%c0_7, %c0_8, %c0_9], %20 {strides = array<i32>} : memref<1x8x128xf32, #tpu.memory_space<vmem>>, vector<1x8x128xf32>,
    %22 = vector.shape_cast %17 : vector<8x128xf32> to vector<1x8x128xf32>
    %cst_10 = arith.constant dense<0.000000e+00> : vector<8x128xf32>
    %23 = vector.multi_reduction <add>, %22, %cst_10 [0] : vector<1x8x128xf32> to vector<8x128xf32>
    %24 = vector.shape_cast %23 : vector<8x128xf32> to vector<1x8x128xf32>
    %c0_11 = arith.constant 0 : index
    %c0_12 = arith.constant 0 : index
    %c0_13 = arith.constant 0 : index
    %25 = vector.load %arg4[%c0_11, %c0_12, %c0_13] : memref<1x8x128xf32, #tpu.memory_space<vmem>>, vector<1x8x128xf32>
    tpu.vector_store %arg4[%c0_11, %c0_12, %c0_13], %24 {strides = array<i32>} : memref<1x8x128xf32, #tpu.memory_space<vmem>>, vector<1x8x128xf32>,
    return
  }
  func.func @transform_0(%arg0: i32) -> (i32, i32) {
    %c0_i32 = arith.constant 0 : i32
    %c0_i32_0 = arith.constant 0 : i32
    return %arg0, %c0_i32 : i32, i32
  }
  func.func @transform_1(%arg0: i32) -> (i32, i32) {
    %c0_i32 = arith.constant 0 : i32
    %c0_i32_0 = arith.constant 0 : i32
    return %arg0, %c0_i32 : i32, i32
  }
  func.func @transform_2(%arg0: i32) -> (i32, i32, i32) {
    %c0_i32 = arith.constant 0 : i32
    %c0_i32_0 = arith.constant 0 : i32
    %c0_i32_1 = arith.constant 0 : i32
    return %arg0, %c0_i32, %c0_i32_0 : i32, i32, i32
  }
  func.func @transform_3(%arg0: i32) -> (i32, i32, i32) {
    %c0_i32 = arith.constant 0 : i32
    %c0_i32_0 = arith.constant 0 : i32
    %c0_i32_1 = arith.constant 0 : i32
    return %arg0, %c0_i32, %c0_i32_0 : i32, i32, i32
  }
}

</mosaic_0001>

<bundles_post_ra>
// kernel: tpu_custom_call.1
= control target key start
LH: loop header
LB: loop body
LE: loop exit
PB: predicated region body
PF: predicated region fallthrough
CT: control target
= control target key end

     0   :  { %9 = vsyncpa [#allocation3], 0  ;;  %s937_s0 = inlined_call_operand.hbm [shape: f32[16,128], index: 0, kind: input, shape index: {}]   ;;  %s938_s1 = inlined_call_operand.hbm [shape: f32[16,128], index: 1, kind: input, shape index: {}]   ;;  %s939_s2 = inlined_call_operand.hbm [shape: f32[2,8,128], index: 2, kind: output, shape index: {0}]   ;;  %s940_s3 = inlined_call_operand.hbm [shape: f32[2,8,128], index: 3, kind: output, shape index: {1}]  }
   0x1   :  { %11 = vsyncpa [#allocation3 + $0x1], 0 }
   0x2   :  { %12 = vsyncpa [#allocation6], 0 }
   0x3   :  { %14 = vsyncpa [#allocation6 + $0x1], 0 }
   0x4   :  { %15 = vsyncpa [#allocation4], 0 }
   0x5   :  { %17 = vsyncpa [#allocation4 + $0x1], 0 }
   0x6   :  { %18 = vsyncpa [#allocation9], 0 }
   0x7   :  { %20 = vsyncpa [#allocation9 + $0x1], 0  ;;  %s687_s12 = smov 0   ;;  %s689_s13 = smov 0  }
   0x8   :  { %s691_s14 = smov 0   ;;  %s693_s15 = smov 0  }
   0x9 LB: > { %s708_s16 = sadd.s32 4294967295, %s660_s15   ;;  %s418_s17 = sadd.s32 4294967294, %s660_s15   ;;  %s660_s15 = sphi %s693_s15, %s959_s15   ;;  %s656_s14 = sphi %s691_s14, %s958_s14   ;;  %s652_s13 = sphi %s689_s13, %s957_s13   ;;  %s648_s12 = sphi %s687_s12, %s956_s12  }
   0xa   : > { %s712_s18 = sadd.s32 1, %s660_s15   ;;  %s33_s19 = sadd.s32 1, %s656_s14 }
   0xb   : > { %s30_s20 = ssub.s32 %s660_s15, %s712_s18  ;;  %p40_p0 = scmp.ne.s32.totalorder %s656_s14, %s652_s13 }
   0xc   : > { %p31_p1 = scmp.eq.s32.totalorder %s30_s20, 0  ;;  %p41_p2 = scmp.eq.s32.totalorder %s660_s15, 0 }
   0xd   : > { %p46_p3 = scmp.ne.s32.totalorder %s652_s13, %s648_s12  ;;  %p47_p4 = scmp.eq.s32.totalorder %s708_s16, 0 }
   0xe   : > { %s724_s21 = scalar_select %p31_p1, %s656_s14, %s33_s19  }
   0xf   : > { %p726_p5 = por %p41_p2, %p40_p0  ;;  %p730_p6 = por %p47_p4, %p46_p3 }
  0x10   : > { %p96_p7 = scmp.eq.s32.totalorder %s708_s16, 1  ;;  %p102_p8 = scmp.eq.s32.totalorder %s418_s17, 1 }
  0x11   : > { %s944_s23 = scalar_select %p730_p6, 1, 0 }
  0x12   : > { %p459_p10 = scmp.lt.s32.totalorder %s660_s15, 2  ;;  %p737_p11 = por %p96_p7, %p40_p0 }
  0x13   : > { %p741_p12 = por %p102_p8, %p46_p3  ;;  %s746_s26 = sand.u32 1, %s656_s14  }
  0x14   : > { %s945_s24 = scalar_select %p737_p11, 1, 0 }
  0x15   : > { %s946_s25 = scalar_select %p741_p12, 1, 0 }
  0x16   : > { %s422_s27 = sshll.u32 %s660_s15, 7  ;;  %s421_s28 = sshll.u32 %s746_s26, 3 }
  0x17   : > { %s755_s4 = scalar_lea.hbm %s937_s0, %s422_s27  ;;  %s152_s5 = scalar_lea.vmem [#allocation2], %s421_s28 }
  0x18   : > { %s159_s6 = sshll.u32 %s152_s5, 4  ;;  %p761_p13 = pnand %p459_p10, %p726_p5  ;;  %s765_s6 = int_to_ptr.vmem [resolvable:$true] %s159_s6 }
  0x19   : > { %s149_s8 = scalar_lea.sflag [#allocation3], %s746_s26  ;;  %s498_s9 = scalar_lea.hbm %s755_s4, 128 }
  0x1a   : > { %p499_p2 = scmp.ne.s32.totalorder %s755_s4, %s498_s9  ;;  %p500_p3 = pneg %p761_p13 }
  0x1b   : > { %s503_s17 = scalar_lea.hbm %s937_s0, 256  ;;  %p504_p5 = scmp.lt.u32.totalorder %s755_s4, %s937_s0 }
  0x1c   : > { %p501_p4 = pnand %p500_p3, %p499_p2  ;;  %p505_p8 = scmp.lt.u32.totalorder %s503_s17, %s498_s9 }
  0x1d   : > { %p507_p9 = scmp.lt.u32.totalorder %s498_s9, %s755_s4 }
  0x1e   : > { %p502_p7 = pneg %p501_p4  ;;  %p506_p10 = por %p505_p8, %p504_p5 }
  0x20   : > { %p508_p0 = por %p507_p9, %p506_p10 }
  0x22   : > { %p509_p1 = pnand %p508_p0, %p502_p7 }
  0x24   : > { %512 = shalt.err (!%p509_p1)
}
  0x25   : > { %s513_s22 = scalar_lea.vmem %s765_s6, 128  ;;  %s662_s29 = smov [#allocation2]  }
  0x26   : > { %p514_p2 = scmp.ne.s32.totalorder %s765_s6, %s513_s22  ;;  %s518_s30 = sshll.u32 %s662_s29, 4  ;;  %s519_s30 = int_to_ptr.vmem [resolvable:$false] %s518_s30 }
  0x27   : > { %s520_s5 = scalar_lea.vmem %s519_s30, 256  ;;  %p521_p11 = scmp.lt.s32.totalorder %s765_s6, %s519_s30 }
  0x28   : > { %p516_p4 = pnand %p514_p2, %p500_p3  ;;  %p522_p5 = scmp.lt.s32.totalorder %s520_s5, %s513_s22 }
  0x2a   : > { %p517_p12 = pneg %p516_p4  ;;  %p523_p8 = por %p522_p5, %p521_p11 }
  0x2c   : > { %p524_p9 = pnand %p523_p8, %p517_p12 }
  0x2e   : > { %527 = shalt.err (!%p524_p9)
}
  0x2f   : > { %448 = dma.hbm_to_vmem [thread:$0]  (!%p761_p13), %s755_s4, 128, %s765_s6, %s149_s8  }
  0x30   : > { %p948_p0 = scmp.lt.s32.totalorder %s660_s15, 3  ;;  %p949_p1 = scmp.ge.s32.totalorder %s660_s15, 1 }
  0x31   : > { %s808_s17 = scalar_lea.hbm %s938_s1, %s422_s27  ;;  %s170_s19 = scalar_lea.vmem [#allocation5], %s421_s28 }
  0x32   : > { %p799_p7 = pnand %p949_p1, %p948_p0  ;;  %s177_s20 = sshll.u32 %s170_s19, 4  ;;  %s178_s20 = int_to_ptr.vmem [resolvable:$true] %s177_s20 }
  0x33   : > { %s167_s4 = scalar_lea.sflag [#allocation6], %s746_s26  ;;  %s528_s6 = scalar_lea.hbm %s808_s17, 128 }
  0x34   : > { %s950_s9 = scalar_select %p799_p7, 1, 0 }
  0x35   : > { %p529_p11 = scmp.ne.s32.totalorder %s808_s17, %s528_s6  ;;  %s533_s27 = scalar_lea.hbm %s938_s1, 256 }
  0x36   : > { %p534_p2 = scmp.lt.u32.totalorder %s808_s17, %s938_s1  ;;  %p535_p4 = scmp.lt.u32.totalorder %s533_s27, %s528_s6 }
  0x37   : > { %p531_p12 = pnand %p529_p11, %p500_p3  ;;  %p537_p8 = scmp.lt.u32.totalorder %s528_s6, %s808_s17 }
  0x38   : > { %p536_p5 = por %p535_p4, %p534_p2 }
  0x39   : > { %p532_p10 = pneg %p531_p12 }
  0x3a   : > { %p538_p9 = por %p537_p8, %p536_p5 }
  0x3c   : > { %p539_p0 = pnand %p538_p9, %p532_p10 }
  0x3e   : > { %542 = shalt.err (!%p539_p0)
}
  0x3f   : > { %s543_s26 = scalar_lea.vmem %s178_s20, 128  ;;  %s663_s28 = smov [#allocation5]  }
  0x40   : > { %p544_p1 = scmp.ne.s32.totalorder %s178_s20, %s543_s26  ;;  %s548_s5 = sshll.u32 %s663_s28, 4  ;;  %s549_s5 = int_to_ptr.vmem [resolvable:$false] %s548_s5 }
  0x41   : > { %s550_s10 = scalar_lea.vmem %s549_s5, 256  ;;  %p551_p6 = scmp.lt.s32.totalorder %s178_s20, %s549_s5 }
  0x42   : > { %p546_p11 = pnand %p544_p1, %p500_p3  ;;  %p552_p7 = scmp.lt.s32.totalorder %s550_s10, %s543_s26 }
  0x44   : > { %p547_p12 = pneg %p546_p11  ;;  %p553_p2 = por %p552_p7, %p551_p6 }
  0x46   : > { %p554_p4 = pnand %p553_p2, %p547_p12 }
  0x48   : > { %557 = shalt.err (!%p554_p4)
}
  0x49   : > { %451 = dma.hbm_to_vmem [thread:$0]  (!%p761_p13), %s808_s17, 128, %s178_s20, %s167_s4  }
  0x4a   : > { %p951_p10 = scmp.ne.s32.totalorder %s950_s9, 0 }
  0x4b   : > { %s835_s11 = sand.u32 (!%p951_p10), 1, %s652_s13   ;;  %p952_p6 = scmp.ne.s32.totalorder (!%p951_p10), %s944_s23, 0 }
  0x4c   : > { %186 = sbr.rel (%p951_p10) target bundleno = 157 (0x9d), region = 28  ;;  %s838_s19 = sshll.u32 (!%p951_p10), %s835_s11, 3 }
  0x4d   : > { %s189_s6 = scalar_lea.sflag (!%p951_p10), [#allocation3], %s835_s11  ;;  %s192_s8 = scalar_lea.vmem (!%p951_p10), [#allocation2], %s838_s19 }
  0x53   : > { %631 = dma.done.wait (%p952_p6), %s189_s6, 128  }
  0x54   : > { %633 = vsyncadd (%p952_p6), %s189_s6, 4294967168  ;;  %s198_s7 = scalar_lea.sflag [#allocation6], %s835_s11  ;;  %s201_s9 = scalar_lea.vmem [#allocation5], %s838_s19 }
  0x55   : > { %635 = dma.done.wait (%p952_p6), %s198_s7, 128  }
  0x56   : > { %637 = vsyncadd (%p952_p6), %s198_s7, 4294967168  ;;  %s233_s17 = scalar_lea.vmem [#allocation8], %s838_s19  ;;  %s433_s4 = sshll.u32 %s708_s16, 7  ;;  %v234_v0 = vld [vmem:[%s192_s8] sm:$0xff]  ;;  %v235_v1 = vld [vmem:[%s201_s9] sm:$0xff]  ;;  %v664_v3 = vmov 0.0  }
  0x57   : > { %s293_s20 = sshll.u32 %s233_s17, 4  ;;  %vm236_vm0 = vcmp.ne.f32.partialorder %v235_v1, 255.0  ;;  %v240_v2 = vand.u32 2147483647, %v234_v0  ;;  %s861_s27 = scalar_lea.hbm %s940_s3, %s433_s4  ;;  %s854_s20 = int_to_ptr.vmem [resolvable:$true] %s293_s20 }
  0x58   : > { %v430_v4 = vsel %vm236_vm0, 1.0, %v664_v3  ;;  %s267_s29 = scalar_lea.sflag [#allocation9], %s835_s11  ;;  %s558_s30 = scalar_lea.vmem %s854_s20, 128 }
  0x59   : > { %v241_v5 = vsub.f32 0.0, %v240_v2  ;;  %260 = vst [vmem:[%s233_s17] sm:$0xff] %v430_v4  ;;  %p559_p13 = scmp.ne.s32.totalorder %s854_s20, %s558_s30  ;;  %p953_p3 = scmp.ne.s32.totalorder %s945_s24, 0 }
  0x5a   : > { %s665_s26 = smov [#allocation8]  }
  0x5b   : > { %p560_p7 = pnand %p559_p13, %p953_p3  ;;  %s562_s28 = sshll.u32 %s665_s26, 4  ;;  %s563_s28 = int_to_ptr.vmem [resolvable:$false] %s562_s28 }
  0x5c   : > { %s564_s5 = scalar_lea.vmem %s563_s28, 256  ;;  %p565_p8 = scmp.lt.s32.totalorder %s854_s20, %s563_s28 }
  0x5d   : > { %p561_p5 = pneg %p560_p7  ;;  %p566_p9 = scmp.lt.s32.totalorder %s564_s5, %s558_s30 }
  0x5f   : > { %p567_p0 = por %p566_p9, %p565_p8 }
  0x61   : > { %p568_p1 = pnand %p567_p0, %p561_p5 }
  0x63   : > { %571 = shalt.err (!%p568_p1)
}
  0x64   : > { %s572_s10 = scalar_lea.hbm %s861_s27, 128  ;;  %s576_s7 = scalar_lea.hbm %s940_s3, 256 }
  0x65   : > { %p573_p11 = scmp.ne.s32.totalorder %s861_s27, %s572_s10  ;;  %p577_p4 = scmp.lt.u32.totalorder %s861_s27, %s940_s3 }
  0x66   : > { %p578_p10 = scmp.lt.u32.totalorder %s576_s7, %s572_s10  ;;  %p580_p13 = scmp.lt.u32.totalorder %s572_s10, %s861_s27 }
  0x67   : > { %p574_p12 = pnand %p573_p11, %p953_p3 }
  0x68   : > { %p579_p6 = por %p578_p10, %p577_p4 }
  0x69   : > { %p575_p2 = pneg %p574_p12 }
  0x6a   : > { %p581_p7 = por %p580_p13, %p579_p6 }
  0x6c   : > { %p582_p5 = pnand %p581_p7, %p575_p2 }
  0x6e   : > { %585 = shalt.err (!%p582_p5)
}
  0x6f   : > { %442 = dma.vmem_to_hbm [thread:$0]  (%p953_p3), %s854_s20, 128, %s861_s27, %s267_s29   ;;  %v242_v6 = vmul.f32 1.442695, %v241_v5  ;;  %v237_v11 = vmax.f32 %v234_v0, 0.0  ;;  %v238_v12 = vmul.f32 %v235_v1, %v234_v0 }
  0x70   : > { %s226_s20 = scalar_lea.vmem [#allocation7], %s838_s19  ;;  %s894_s29 = scalar_lea.hbm %s939_s2, %s433_s4 }
  0x71   : > { %494 = vpow2.f32 %v242_v6  ;;  %v239_v16 = vsub.f32 %v237_v11, %v238_v12  ;;  %s280_s23 = sshll.u32 %s226_s20, 4  ;;  %s262_s30 = scalar_lea.sflag [#allocation4], %s835_s11  ;;  %s887_s23 = int_to_ptr.vmem [resolvable:$true] %s280_s23 }
  0x72   : > { %s586_s26 = scalar_lea.vmem %s887_s23, 128  ;;  %s666_s19 = smov [#allocation7]  }
  0x73   : > { %p587_p8 = scmp.ne.s32.totalorder %s887_s23, %s586_s26  ;;  %s590_s28 = sshll.u32 %s666_s19, 4  ;;  %s591_s28 = int_to_ptr.vmem [resolvable:$false] %s590_s28 }
  0x74   : > { %s592_s16 = scalar_lea.vmem %s591_s28, 256  ;;  %p593_p1 = scmp.lt.s32.totalorder %s887_s23, %s591_s28 }
  0x75   : > { %p588_p9 = pnand %p587_p8, %p953_p3  ;;  %p594_p11 = scmp.lt.s32.totalorder %s592_s16, %s586_s26 }
  0x77   : > { %p589_p0 = pneg %p588_p9  ;;  %p595_p12 = por %p594_p11, %p593_p1 }
  0x79   : > { %p596_p2 = pnand %p595_p12, %p589_p0 }
  0x7b   : > { %v495_v7 = vpop.eup %494 }
  0x7c   : > { %v244_v8 = vadd.f32 1.0, %v495_v7  ;;  %v247_v9 = vmul.f32 -0.5, %v495_v7  ;;  %v250_v13 = vand.u32 2147483647, %v495_v7 }
  0x7e   : > { %496 = vlog2.f32 %v244_v8  ;;  %v248_v10 = vadd.f32 1.0, %v247_v9  ;;  %vm251_vm1 = vcmp.lt.f32.partialorder %v250_v13, 0.0004427343 }
  0x80   : > { %v249_v14 = vmul.f32 %v495_v7, %v248_v10 }
  0x88   : > { %v497_v15 = vpop.eup %496 }
  0x89   : > { %v246_v17 = vmul.f32 0.6931472, %v497_v15 }
  0x8b   : > { %v252_v18 = vsel %vm251_vm1, %v249_v14, %v246_v17 }
  0x8c   : > { %v253_v19 = vadd.f32 %v252_v18, %v239_v16 }
  0x8e   : > { %v254_v20 = vsel %vm236_vm0, %v253_v19, 0.0 }
  0x8f   : > { %258 = vst [vmem:[%s226_s20] sm:$0xff] %v254_v20 }
  0x90   : > { %599 = shalt.err (!%p596_p2)
}
  0x91   : > { %s600_s11 = scalar_lea.hbm %s894_s29, 128  ;;  %s604_s10 = scalar_lea.hbm %s939_s2, 256 }
  0x92   : > { %p601_p4 = scmp.ne.s32.totalorder %s894_s29, %s600_s11  ;;  %p605_p13 = scmp.lt.u32.totalorder %s894_s29, %s939_s2 }
  0x93   : > { %p606_p7 = scmp.lt.u32.totalorder %s604_s10, %s600_s11  ;;  %p608_p8 = scmp.lt.u32.totalorder %s600_s11, %s894_s29 }
  0x94   : > { %p602_p10 = pnand %p601_p4, %p953_p3 }
  0x95   : > { %p607_p5 = por %p606_p7, %p605_p13 }
  0x96   : > { %p603_p6 = pneg %p602_p10 }
  0x97   : > { %p609_p9 = por %p608_p8, %p607_p5 }
  0x99   : > { %p610_p0 = pnand %p609_p9, %p603_p6 }
  0x9b   : > { %613 = shalt.err (!%p610_p0)
}
  0x9c   : > { %441 = dma.vmem_to_hbm [thread:$0]  (%p953_p3), %s887_s23, 128, %s894_s29, %s262_s30  }
  0x9d PF: > { %s305_s7 = sand.u32 1, %s648_s12   ;;  %p954_p1 = scmp.ne.s32.totalorder %s946_s25, 0 }
  0x9e   : > { %p955_p11 = scmp.ge.s32.totalorder %s660_s15, 2  ;;  %s306_s9 = scalar_lea.sflag [#allocation4], %s305_s7 }
  0xa0   : > { %p453_p12 = pnand %p955_p11, %p954_p1 }
  0xa2   : > { %639 = dma.done.wait (!%p453_p12), %s306_s9, 128  }
  0xa3   : > { %641 = vsyncadd (!%p453_p12), %s306_s9, 4294967168  ;;  %s315_s17 = scalar_lea.sflag [#allocation9], %s305_s7 }
  0xa4   : > { %643 = dma.done.wait (!%p453_p12), %s315_s17, 128  }
  0xa5   : > { %645 = vsyncadd (!%p453_p12), %s315_s17, 4294967168  ;;  %p23_p3 = scmp.ge.s32.totalorder %s712_s18, 4   ;;  %s956_s12 = smov %s652_s13 }
  0xa6   : > { %s957_s13 = smov %s656_s14  ;;  %s958_s14 = smov %s724_s21 }
  0xa7   : > { %s959_s15 = smov %s712_s18  ;;  %25 = sbr.rel (!%p23_p3) target bundleno = 9 (0x9), region = 103 }
  0xae   :  { %320 = vsyncpa [#allocation3], 1 }
  0xaf   :  { %322 = vsyncpa [#allocation3 + $0x1], 1 }
  0xb0   :  { %323 = vsyncpa [#allocation6], 1 }
  0xb1   :  { %325 = vsyncpa [#allocation6 + $0x1], 1 }
  0xb2   :  { %326 = vsyncpa [#allocation4], 1 }
  0xb3   :  { %328 = vsyncpa [#allocation4 + $0x1], 1 }
  0xb4   :  { %329 = vsyncpa [#allocation9], 1 }
  0xb5   :  { %331 = vsyncpa [#allocation9 + $0x1], 1 }

</bundles_post_ra>
